<compile_context>
chip_gen: v7x
topology: tpu7x:2x2x1
jax: 0.10.0
libtpu: 0.0.40
codegen_flags: <defaults>
</compile_context>

<pallas_src>
import functools

import jax
import jax.numpy as jnp
from jax.experimental import pallas as pl
from jax.experimental.pallas import tpu as pltpu

EPS = 1e-5  # nn.InstanceNorm2d default eps


# --------------------------------------------------------------------------
# Tiling helpers
# --------------------------------------------------------------------------
def _device_kind():
    try:
        return jax.devices()[0].device_kind.lower()
    except Exception:
        return ""


def _tile_target_bytes(kind):
    # v6e / v7x: 32 MiB default scoped VMEM + fast HBM -> bigger tiles to
    # amortize the ~0.35us per-grid-step overhead.  v5e / unknown: stay small
    # enough that 2x-in + 2x-out + temps fit the 16 MiB default scoped VMEM.
    if any(tag in kind for tag in ("v6", "v7", "7x")):
        return 4 << 20
    return 2 << 20


def _channel_tile_candidates(C):
    """Channel tiles that satisfy the (8,128) rule: multiples of 8 dividing C,
    plus C itself (full-dim block)."""
    cands = {C}
    d = 8
    while d < C:
        if C % d == 0:
            cands.add(d)
        d += 8
    return sorted(cands, reverse=True)  # largest first


def _choose_c_tile_fused(C, hw_pad, itemsize, target_bytes, prefer_split):
    cands = _channel_tile_candidates(C)
    fitting = [c for c in cands if c * hw_pad * itemsize <= target_bytes]
    if prefer_split:
        split = [c for c in fitting if C // c >= 2]
        if split:
            return split[0]
    if fitting:
        return fitting[0]
    return cands[-1]  # smallest possible; caller may fall back to the split path


def _choose_c_tile_apply(C, itemsize, target_bytes):
    for c in _channel_tile_candidates(C):
        if c * 128 * itemsize <= target_bytes:
            return c
    return _channel_tile_candidates(C)[-1]


def _choose_hw_tile(hw_pad, c_tile, itemsize, target_bytes):
    """Largest multiple of 128 that divides hw_pad and keeps the tile under
    target_bytes (>= 128)."""
    n128 = hw_pad // 128
    best = 128
    q = 1
    while q <= n128:
        if n128 % q == 0:
            hw_t = q * 128
            if c_tile * hw_t * itemsize <= target_bytes:
                best = hw_t
        q += 1
    return best


# --------------------------------------------------------------------------
# Kernels
# --------------------------------------------------------------------------
def _adain_fused_kernel(img_ref, style_ref, out_ref, *, hw_real):
    """Fused instance-norm + style affine on one (c_tile, hw_pad) tile.

    img_ref/out_ref: (c_tile, hw_pad); style_ref: (c_tile, 2) = [scale, shift].
    Padded lanes (if any) are exact zeros in the input and are excluded from
    the statistics analytically.
    """
    x = img_ref[...].astype(jnp.float32)
    hw_pad = x.shape[-1]
    n_pad = hw_pad - hw_real
    inv_n = jnp.float32(1.0 / hw_real)

    # Two-pass, mean-subtracted (biased) variance, like InstanceNorm2d.
    mean = jnp.sum(x, axis=-1, keepdims=True) * inv_n          # zeros add 0
    centered = x - mean
    css = jnp.sum(centered * centered, axis=-1, keepdims=True)
    if n_pad:
        # Each padded zero contributed (0 - mean)^2 = mean^2; remove exactly.
        css = css - jnp.float32(n_pad) * mean * mean
    var = jnp.maximum(css * inv_n, 0.0)
    inv_std = jax.lax.rsqrt(var + EPS)

    # Fold style + normalization into one affine: out = x*a + b (single store).
    a = style_ref[:, 0:1] * inv_std            # (c_tile, 1)
    b = style_ref[:, 1:2] - a * mean           # (c_tile, 1)
    out_ref[...] = (x * a + b).astype(out_ref.dtype)


def _adain_apply_kernel(img_ref, ab_ref, out_ref):
    """Streaming per-channel affine: out = x*a + b.

    img_ref/out_ref: (c_tile, hw_tile); ab_ref: (c_tile, 2) = [a, b].
    """
    x = img_ref[...].astype(jnp.float32)
    a = ab_ref[:, 0:1]
    b = ab_ref[:, 1:2]
    out_ref[...] = (x * a + b).astype(out_ref.dtype)


# --------------------------------------------------------------------------
# Forward wrapper
# --------------------------------------------------------------------------
def adain_forward(image, w, w_scale_weight, w_scale_bias, w_shift_weight,
                  w_shift_bias, gain=2, *, force_spatial_split=False):
    """
    image: (N, C, H, W) float32 or bfloat16
    w:     (N, w_dim)
    w_*_weight: (C, w_dim), w_*_bias: (C,)
    """
    N, C, H, W = image.shape
    w_dim = w.shape[1]
    HW = H * W
    ws_gain_scale = (gain / w_dim) ** 0.5

    # --- Style path hoisted out of the grid: one batched matmul each. ---
    wv = w.astype(jnp.float32) * ws_gain_scale
    style_scale = wv @ w_scale_weight.T.astype(jnp.float32) + w_scale_bias.astype(jnp.float32)
    style_shift = wv @ w_shift_weight.T.astype(jnp.float32) + w_shift_bias.astype(jnp.float32)

    kind = _device_kind()
    target = _tile_target_bytes(kind)
    prefer_split = (N == 1) and ("7" in kind)  # keep both v7x TensorCores busy
    itemsize = jnp.dtype(image.dtype).itemsize

    # Pad the spatial axis to a multiple of 128 lanes for unmasked lane-dense
    # stores.  Stats use the real element count, so padding is correctness-safe.
    hw_pad = ((HW + 127) // 128) * 128
    img3 = image.reshape(N, C, HW)
    if hw_pad != HW:
        img3 = jnp.pad(img3, ((0, 0), (0, 0), (0, hw_pad - HW)))

    c_tile = _choose_c_tile_fused(C, hw_pad, itemsize, target, prefer_split)
    fused_tile_bytes = c_tile * hw_pad * itemsize

    if fused_tile_bytes <= target and not force_spatial_split:
        # ---- Path A: single HBM read, fused instance-norm + style affine ----
        style = jnp.stack([style_scale, style_shift], axis=-1).astype(jnp.float32)  # (N,C,2)
        grid = (N, C // c_tile)
        vmem_bytes = int(min(max(8 * fused_tile_bytes + (4 << 20), 16 << 20), 48 << 20))
        out = pl.pallas_call(
            functools.partial(_adain_fused_kernel, hw_real=HW),
            out_shape=jax.ShapeDtypeStruct((N, C, hw_pad), image.dtype),
            grid_spec=pltpu.PrefetchScalarGridSpec(
                num_scalar_prefetch=0,
                grid=grid,
                in_specs=[
                    # Leading batch dim squeezed -> kernel sees 2-D lane-dense tiles.
                    pl.BlockSpec((None, c_tile, hw_pad), lambda n, c: (n, c, 0)),  # image
                    pl.BlockSpec((None, c_tile, 2), lambda n, c: (n, c, 0)),       # [scale,shift]
                ],
                out_specs=pl.BlockSpec((None, c_tile, hw_pad), lambda n, c: (n, c, 0)),
            ),
            compiler_params=pltpu.CompilerParams(
                dimension_semantics=("parallel", "parallel"),
                vmem_limit_bytes=vmem_bytes),
        )(img3, style)
    else:
        # ---- Path B: large spatial extent -> split HW across the grid. ----
        # Stats reduced once in XLA (accurate two-pass mean/var in f32), folded
        # into a per-channel affine; the Pallas kernel is a pure streaming
        # x*a + b over (c_tile, hw_tile) tiles, so no tile ever exceeds the
        # VMEM budget regardless of image size.
        x32 = image.astype(jnp.float32).reshape(N, C, HW)
        mean = jnp.mean(x32, axis=-1)                                  # (N, C)
        var = jnp.mean(jnp.square(x32 - mean[..., None]), axis=-1)     # biased
        inv_std = jax.lax.rsqrt(var + EPS)
        a = style_scale * inv_std
        b = style_shift - a * mean
        ab = jnp.stack([a, b], axis=-1).astype(jnp.float32)            # (N, C, 2)

        c_tile_b = _choose_c_tile_apply(C, itemsize, target)
        hw_tile = _choose_hw_tile(hw_pad, c_tile_b, itemsize, target)
        grid = (N, C // c_tile_b, hw_pad // hw_tile)
        out = pl.pallas_call(
            _adain_apply_kernel,
            out_shape=jax.ShapeDtypeStruct((N, C, hw_pad), image.dtype),
            grid_spec=pltpu.PrefetchScalarGridSpec(
                num_scalar_prefetch=0,
                grid=grid,
                in_specs=[
                    pl.BlockSpec((None, c_tile_b, hw_tile), lambda n, c, k: (n, c, k)),
                    pl.BlockSpec((None, c_tile_b, 2), lambda n, c, k: (n, c, 0)),
                ],
                out_specs=pl.BlockSpec((None, c_tile_b, hw_tile),
                                       lambda n, c, k: (n, c, k)),
            ),
            compiler_params=pltpu.CompilerParams(
                dimension_semantics=("parallel", "parallel", "parallel")),
        )(img3, ab)

    if hw_pad != HW:
        out = out[:, :, :HW]
    return out.reshape(N, C, H, W)


# --------------------------------------------------------------------------
# Pure-JAX reference (mirrors the PyTorch forward)
# --------------------------------------------------------------------------
def adain_reference(image, w, w_scale_weight, w_scale_bias, w_shift_weight,
                    w_shift_bias, gain=2):
    w_dim = w.shape[1]
    scale = (gain / w_dim) ** 0.5
    mean = image.mean(axis=(2, 3), keepdims=True)
    var = image.var(axis=(2, 3), keepdims=True)  # biased, like InstanceNorm2d
    normalized = (image - mean) / jnp.sqrt(var + EPS)
    style_scale = (w * scale) @ w_scale_weight.T + w_scale_bias
    style_shift = (w * scale) @ w_shift_weight.T + w_shift_bias
    return style_scale[:, :, None, None] * normalized + style_shift[:, :, None, None]


if __name__ == "__main__":
    key = jax.random.PRNGKey(0)
    k_img, k_w, k_wsc, k_wsh, k_img2 = jax.random.split(key, 5)

    N, C, w_dim = 2, 4, 8

    # WSLinear init: weight ~ N(0,1), bias = 0.
    w_scale_weight = jax.random.normal(k_wsc, (C, w_dim), dtype=jnp.float32)
    w_scale_bias = jnp.zeros((C,), dtype=jnp.float32)
    w_shift_weight = jax.random.normal(k_wsh, (C, w_dim), dtype=jnp.float32)
    w_shift_bias = jnp.zeros((C,), dtype=jnp.float32)
    w_vec = jax.random.normal(k_w, (N, w_dim), dtype=jnp.float32)

    # 1) Fused path, HW already a multiple of 128.
    image = jax.random.normal(k_img, (N, C, 16, 16), dtype=jnp.float32)
    out = jax.block_until_ready(
        adain_forward(image, w_vec, w_scale_weight, w_scale_bias,
                      w_shift_weight, w_shift_bias))
    ref = adain_reference(image, w_vec, w_scale_weight, w_scale_bias,
                          w_shift_weight, w_shift_bias)
    assert out.shape == image.shape
    assert jnp.allclose(out, ref, atol=1e-4, rtol=1e-4), "fused path mismatch"

    # 2) Fused path with ragged HW (10x10 -> padded to 128 lanes + masked stats).
    image2 = jax.random.normal(k_img2, (N, C, 10, 10), dtype=jnp.float32) + 3.0
    out2 = jax.block_until_ready(
        adain_forward(image2, w_vec, w_scale_weight, w_scale_bias,
                      w_shift_weight, w_shift_bias))
    ref2 = adain_reference(image2, w_vec, w_scale_weight, w_scale_bias,
                           w_shift_weight, w_shift_bias)
    assert jnp.allclose(out2, ref2, atol=1e-4, rtol=1e-4), "padded path mismatch"

    # 3) Spatial-split (large-image) path forced at small shapes for coverage.
    out3 = jax.block_until_ready(
        adain_forward(image, w_vec, w_scale_weight, w_scale_bias,
                      w_shift_weight, w_shift_bias, force_spatial_split=True))
    assert jnp.allclose(out3, ref, atol=1e-4, rtol=1e-4), "split path mismatch"

    print("KERNEL_OK")
</pallas_src>

<mosaic_0001>
module attributes {stable_mosaic.version = 11 : i64} {
  func.func @_adain_fused_kernel(%arg0: i32, %arg1: i32, %arg2: memref<1x4x256xf32, #tpu.memory_space<vmem>>, %arg3: memref<1x4x2xf32, #tpu.memory_space<vmem>>, %arg4: memref<1x4x256xf32, #tpu.memory_space<vmem>>) attributes {dimension_semantics = [#tpu.dimension_semantics<parallel>, #tpu.dimension_semantics<parallel>], iteration_bounds = array<i64: 2, 1>, scalar_prefetch = 0 : i64, scratch_operands = 0 : i64, tpu.core_type = #tpu.core_type<tc>, window_params = [{transform_indices = @transform_0, window_bounds = array<i64: 1, 4, 256>}, {transform_indices = @transform_1, window_bounds = array<i64: 1, 4, 2>}, {transform_indices = @transform_2, window_bounds = array<i64: 1, 4, 256>}]} {
    %c0 = arith.constant 0 : index
    %c0_0 = arith.constant 0 : index
    %c0_1 = arith.constant 0 : index
    %0 = vector.load %arg2[%c0, %c0_0, %c0_1] : memref<1x4x256xf32, #tpu.memory_space<vmem>>, vector<1x4x256xf32>
    %1 = vector.shape_cast %0 : vector<1x4x256xf32> to vector<4x256xf32>
    %cst = arith.constant dense<0.000000e+00> : vector<4xf32>
    %2 = vector.multi_reduction <add>, %1, %cst [1] : vector<4x256xf32> to vector<4xf32>
    %3 = vector.shape_cast %2 : vector<4xf32> to vector<4x1xf32>
    %cst_2 = arith.constant 3.906250e-03 : f32
    %4 = vector.broadcast %cst_2 : f32 to vector<4x1xf32>
    %5 = arith.mulf %3, %4 : vector<4x1xf32>
    %6 = vector.broadcast %5 : vector<4x1xf32> to vector<4x256xf32>
    %7 = arith.subf %1, %6 : vector<4x256xf32>
    %8 = arith.mulf %7, %7 : vector<4x256xf32>
    %cst_3 = arith.constant dense<0.000000e+00> : vector<4xf32>
    %9 = vector.multi_reduction <add>, %8, %cst_3 [1] : vector<4x256xf32> to vector<4xf32>
    %10 = vector.shape_cast %9 : vector<4xf32> to vector<4x1xf32>
    %cst_4 = arith.constant 3.906250e-03 : f32
    %11 = vector.broadcast %cst_4 : f32 to vector<4x1xf32>
    %12 = arith.mulf %10, %11 : vector<4x1xf32>
    %cst_5 = arith.constant 0.000000e+00 : f32
    %13 = vector.broadcast %cst_5 : f32 to vector<4x1xf32>
    %14 = arith.maximumf %12, %13 : vector<4x1xf32>
    %cst_6 = arith.constant 9.99999974E-6 : f32
    %15 = vector.broadcast %cst_6 : f32 to vector<4x1xf32>
    %16 = arith.addf %14, %15 : vector<4x1xf32>
    %17 = math.rsqrt %16 : vector<4x1xf32>
    %c0_7 = arith.constant 0 : index
    %c0_8 = arith.constant 0 : index
    %c0_9 = arith.constant 0 : index
    %18 = vector.load %arg3[%c0_7, %c0_8, %c0_9] : memref<1x4x2xf32, #tpu.memory_space<vmem>>, vector<1x4x1xf32>
    %19 = vector.shape_cast %18 : vector<1x4x1xf32> to vector<4x1xf32>
    %20 = arith.mulf %19, %17 : vector<4x1xf32>
    %c0_10 = arith.constant 0 : index
    %c0_11 = arith.constant 0 : index
    %c1 = arith.constant 1 : index
    %21 = vector.load %arg3[%c0_10, %c0_11, %c1] : memref<1x4x2xf32, #tpu.memory_space<vmem>>, vector<1x4x1xf32>
    %22 = vector.shape_cast %21 : vector<1x4x1xf32> to vector<4x1xf32>
    %23 = arith.mulf %20, %5 : vector<4x1xf32>
    %24 = arith.subf %22, %23 : vector<4x1xf32>
    %25 = vector.broadcast %20 : vector<4x1xf32> to vector<4x256xf32>
    %26 = arith.mulf %1, %25 : vector<4x256xf32>
    %27 = vector.broadcast %24 : vector<4x1xf32> to vector<4x256xf32>
    %28 = arith.addf %26, %27 : vector<4x256xf32>
    %c0_12 = arith.constant 0 : index
    %c0_13 = arith.constant 0 : index
    %c0_14 = arith.constant 0 : index
    %29 = vector.load %arg4[%c0_12, %c0_13, %c0_14] : memref<1x4x256xf32, #tpu.memory_space<vmem>>, vector<1x4x256xf32>
    %30 = vector.shape_cast %29 : vector<1x4x256xf32> to vector<4x256xf32>
    %31 = vector.shape_cast %28 : vector<4x256xf32> to vector<1x4x256xf32>
    tpu.vector_store %arg4[%c0_12, %c0_13, %c0_14], %31 {strides = array<i32>} : memref<1x4x256xf32, #tpu.memory_space<vmem>>, vector<1x4x256xf32>,
    return
  }
  func.func @transform_0(%arg0: i32, %arg1: i32) -> (i32, i32, i32) {
    %c0_i32 = arith.constant 0 : i32
    %c0_i32_0 = arith.constant 0 : i32
    return %arg0, %arg1, %c0_i32 : i32, i32, i32
  }
  func.func @transform_1(%arg0: i32, %arg1: i32) -> (i32, i32, i32) {
    %c0_i32 = arith.constant 0 : i32
    %c0_i32_0 = arith.constant 0 : i32
    return %arg0, %arg1, %c0_i32 : i32, i32, i32
  }
  func.func @transform_2(%arg0: i32, %arg1: i32) -> (i32, i32, i32) {
    %c0_i32 = arith.constant 0 : i32
    %c0_i32_0 = arith.constant 0 : i32
    return %arg0, %arg1, %c0_i32 : i32, i32, i32
  }
}

</mosaic_0001>

<bundles_post_ra>
// kernel: tpu_custom_call.1
= control target key start
LH: loop header
LB: loop body
LE: loop exit
PB: predicated region body
PF: predicated region fallthrough
CT: control target
= control target key end

     0   :  { %7 = vsyncpa [#allocation3], 0  ;;  %s800_s0 = inlined_call_operand.hbm [shape: f32[2,4,256], index: 0, kind: input, shape index: {}]   ;;  %s801_s1 = inlined_call_operand.vmem [shape: f32[2,4,2], index: 1, kind: input, shape index: {}]   ;;  %s802_s2 = inlined_call_operand.hbm [shape: f32[2,4,256], index: 2, kind: output, shape index: {}]  }
   0x1   :  { %9 = vsyncpa [#allocation3 + $0x1], 0 }
   0x2   :  { %10 = vsyncpa [#allocation4], 0 }
   0x3   :  { %12 = vsyncpa [#allocation4 + $0x1], 0  ;;  %s615_s9 = smov 0   ;;  %s617_s10 = smov 0  }
   0x4   :  { %s619_s11 = smov 0   ;;  %s621_s12 = smov 0  }
   0x5   :  { %s623_s13 = smov 0   ;;  %s625_s14 = smov 0  }
   0x6 LB: > { %s391_s15 = sadd.s32 4294967295, %s592_s14   ;;  %s392_s16 = sadd.s32 4294967294, %s592_s14   ;;  %s592_s14 = sphi %s625_s14, %s18_s14   ;;  %s588_s13 = sphi %s623_s13, %s818_s13   ;;  %s584_s12 = sphi %s621_s12, %s817_s12   ;;  %s580_s11 = sphi %s619_s11, %s816_s11   ;;  %s576_s10 = sphi %s617_s10, %s815_s10   ;;  %s572_s9 = sphi %s615_s9, %s814_s9  }
   0x7   : > { %s30_s17 = sadd.s32 1, %s588_s13  ;;  %s39_s18 = sadd.s32 1, %s580_s11 }
   0x8   : > { %p32_p0 = scmp.ge.s32.totalorder %s30_s17, 2  ;;  %p46_p1 = scmp.ne.s32.totalorder %s580_s11, %s576_s10 }
   0x9   : > { %p47_p2 = scmp.eq.s32.totalorder %s592_s14, 0  ;;  %p52_p3 = scmp.ne.s32.totalorder %s576_s10, %s572_s9 }
   0xa   : > { %s820_s17 = smov (%p32_p0, %s30_s17), 0  ;;  %p53_p5 = scmp.eq.s32.totalorder %s391_s15, 0 }
   0xb   : > { %p656_p4 = por %p47_p2, %p46_p1  ;;  %s34_s20 = ssub.s32 %s588_s13, %s820_s17 }
   0xc   : > { %p106_p6 = scmp.eq.s32.totalorder %s391_s15, 1  ;;  %p37_p7 = scmp.eq.s32.totalorder %s34_s20, 0 }
   0xd   : > { %p662_p8 = por %p53_p5, %p52_p3  ;;  %p112_p10 = scmp.eq.s32.totalorder %s392_s16, 1 }
   0xe   : > { %p666_p9 = por %p106_p6, %p46_p1  ;;  %p421_p13 = scmp.lt.s32.totalorder %s592_s14, 2 }
   0xf   : > { %s671_s23 = scalar_select %p37_p7, %s580_s11, %s39_s18  }
  0x10   : > { %s806_s22 = scalar_select %p666_p9, 1, 0 }
  0x11   : > { %p673_p11 = por %p112_p10, %p52_p3  ;;  %s132_s25 = sand.u32 1, %s580_s11  }
  0x12   : > { %s395_s26 = sshll.u32 %s132_s25, 3  ;;  %s407_s27 = sshll.u32 %s588_s13, 7 }
  0x13   : > { %s807_s24 = scalar_select %p673_p11, 1, 0 }
  0x14   : > { %s684_s30 = scalar_lea.hbm %s800_s0, %s407_s27  ;;  %s136_s3 = scalar_lea.vmem [#allocation2], %s395_s26 }
  0x15   : > { %s146_s4 = sshll.u32 %s136_s3, 4  ;;  %p690_p0 = pnand %p421_p13, %p656_p4  ;;  %s686_s4 = int_to_ptr.vmem [resolvable:$true] %s146_s4 }
  0x16   : > { %s133_s6 = scalar_lea.sflag [#allocation3], %s132_s25  ;;  %s480_s7 = scalar_lea.hbm %s684_s30, 128 }
  0x17   : > { %p481_p3 = scmp.ne.s32.totalorder %s684_s30, %s480_s7  ;;  %p482_p5 = pneg %p690_p0 }
  0x18   : > { %s485_s16 = scalar_lea.hbm %s800_s0, 256  ;;  %p486_p4 = scmp.lt.u32.totalorder %s684_s30, %s800_s0 }
  0x19   : > { %p483_p6 = pnand %p482_p5, %p481_p3  ;;  %p487_p10 = scmp.lt.u32.totalorder %s485_s16, %s480_s7 }
  0x1a   : > { %p489_p12 = scmp.lt.u32.totalorder %s480_s7, %s684_s30 }
  0x1b   : > { %p484_p7 = pneg %p483_p6  ;;  %p488_p13 = por %p487_p10, %p486_p4 }
  0x1d   : > { %p490_p1 = por %p489_p12, %p488_p13 }
  0x1f   : > { %p491_p2 = pnand %p490_p1, %p484_p7 }
  0x21   : > { %494 = shalt.err (!%p491_p2)
}
  0x22   : > { %s495_s20 = scalar_lea.vmem %s686_s4, 128  ;;  %s594_s25 = smov [#allocation2]  }
  0x23   : > { %p496_p3 = scmp.ne.s32.totalorder %s686_s4, %s495_s20  ;;  %s500_s26 = sshll.u32 %s594_s25, 4  ;;  %s501_s26 = int_to_ptr.vmem [resolvable:$false] %s500_s26 }
  0x24   : > { %s502_s27 = scalar_lea.vmem %s501_s26, 256  ;;  %p503_p9 = scmp.lt.s32.totalorder %s686_s4, %s501_s26 }
  0x25   : > { %p498_p6 = pnand %p496_p3, %p482_p5  ;;  %p504_p4 = scmp.lt.s32.totalorder %s502_s27, %s495_s20 }
  0x27   : > { %p499_p11 = pneg %p498_p6  ;;  %p505_p10 = por %p504_p4, %p503_p9 }
  0x29   : > { %p506_p12 = pnand %p505_p10, %p499_p11 }
  0x2b   : > { %509 = shalt.err (!%p506_p12)
}
  0x2c   : > { %416 = dma.hbm_to_vmem [thread:$0]  (!%p690_p0), %s684_s30, 128, %s686_s4, %s133_s6  }
  0x2d   : > { %p809_p1 = scmp.lt.s32.totalorder %s592_s14, 3  ;;  %p810_p2 = scmp.ge.s32.totalorder %s592_s14, 1 }
  0x2f   : > { %p162_p5 = pnand %p810_p2, %p809_p1 }
  0x30   : > { %s726_s28 = sand.u32 (!%p162_p5), 1, %s576_s10  }
  0x31   : > { %165 = sbr.rel (%p162_p5) target bundleno = 644 (0x284), region = 28  ;;  %s399_s29 = sshll.u32 (!%p162_p5), %s726_s28, 3 }
  0x32   : > { %s168_s3 = scalar_lea.sflag (!%p162_p5), [#allocation3], %s726_s28  ;;  %s171_s5 = scalar_lea.vmem (!%p162_p5), [#allocation2], %s399_s29 }
  0x38   : > { %563 = dma.done.wait (%p662_p8), %s168_s3, 128  }
  0x39   : > { %565 = vsyncadd (%p662_p8), %s168_s3, 4294967168  ;;  %vm210_vm0 = vcmask 1043456   ;;  %v206_v0 = vld [vmem:[%s171_s5] sm:$0xff]  ;;  %v595_v5 = vmov 839922192   ;;  %v221_v7 = vlaneseq  ;;  %v596_v20 = vmov 0  }
  0x3a   : > { %v208_v1 = vcombine.high %v206_v0, %v206_v0  ;;  %v211_v2 = vsel %vm210_vm0, %v206_v0, 0.0  ;;  %v219_v6 = vunpack.c.l.s4 %v595_v5  ;;  %475 = vset.pattern.permute.xlu1 %v596_v20  ;;  %p199_p8 = scmp.lt.s32.totalorder %s584_s12, 1  ;;  %v597_v25 = vmov 1   ;;  %s598_s8 = smov 1  }
  0x3b   : > { %v222_v9 = vshrl.u32 %v221_v7, 7  ;;  %476 = vset.pattern.permute.xlu0 %v597_v25  ;;  %s408_s15 = sshll.u32 %s584_s12, 7  ;;  %s198_s16 = scalar_lea.vmem [#allocation5], %s399_s29 }
  0x3c   : > { %v212_v3 = vsel %vm210_vm0, %v208_v1, 0.0  ;;  %v220_v8 = vunpack.c.0.s8 %v219_v6  ;;  %s200_s21 = scalar_select %p199_p8, %s584_s12, 1 }
  0x3d   : > { %v213_v4 = vadd.f32 %v212_v3, %v211_v2  ;;  %s292_s18 = sshll.u32 %s198_s16, 4  ;;  %s751_s25 = scalar_lea.hbm %s802_s2, %s408_s15  ;;  %s753_s18 = int_to_ptr.vmem [resolvable:$true] %s292_s18 }
  0x3e   : > { %v223_v10 = vsub.s32 %v220_v8, %v222_v9  ;;  %s401_s30 = sshll.u32 %s200_s21, 2  ;;  %s276_s26 = scalar_lea.sflag [#allocation4], %s726_s28 }
  0x3f   : > { %214 = vadd.xlane.f32.xlu0 %v213_v4  ;;  %s205_s7 = scalar_lea.vmem %s801_s1, %s401_s30  ;;  %s510_s27 = scalar_lea.vmem %s753_s18, 128 }
  0x40   : > { %v240_v26 = vld [vmem:[%s205_s7] sm:$0xf]  ;;  %p511_p9 = scmp.ne.s32.totalorder %s753_s18, %s510_s27  ;;  %p811_p11 = scmp.ne.s32.totalorder %s806_s22, 0 }
  0x41   : > { %s599_s12 = smov [#allocation5]  }
  0x42   : > { %p512_p0 = pnand %p511_p9, %p811_p11  ;;  %s514_s29 = sshll.u32 %s599_s12, 4  ;;  %s515_s29 = int_to_ptr.vmem [resolvable:$false] %s514_s29 }
  0x43   : > { %s516_s3 = scalar_lea.vmem %s515_s29, 256  ;;  %p517_p13 = scmp.lt.s32.totalorder %s753_s18, %s515_s29 }
  0x44   : > { %p513_p7 = pneg %p512_p0  ;;  %p518_p3 = scmp.lt.s32.totalorder %s516_s3, %s510_s27 }
  0x46   : > { %p519_p6 = por %p518_p3, %p517_p13 }
  0x48   : > { %p520_p4 = pnand %p519_p6, %p513_p7 }
  0xcc   : > { %v215_v11 = vpop.xlane.xlu0 %214 }
  0xcd   : > { %v216_v12 = vmul.f32 0.00390625, %v215_v11 }
  0xcf   : > { %v224_v13 = vrot.slane %v216_v12, %v223_v10 }
  0xd1   : > { %v226_v14 = vsub.f32 %v206_v0, %v224_v13 }
  0xd3   : > { %v227_v15 = vmul.f32 %v226_v14, %v226_v14 }
  0xd5   : > { %v229_v16 = vcombine.high %v227_v15, %v227_v15  ;;  %v231_v17 = vsel %vm210_vm0, %v227_v15, 0.0 }
  0xd7   : > { %v232_v18 = vsel %vm210_vm0, %v229_v16, 0.0 }
  0xd8   : > { %v233_v19 = vadd.f32 %v232_v18, %v231_v17 }
  0xda   : > { %234 = vadd.xlane.f32.xlu0 %v233_v19 }
 0x167   : > { %v235_v21 = vpop.xlane.xlu0 %234 }
 0x168   : > { %v236_v22 = vmul.f32 0.00390625, %v235_v21 }
 0x16a   : > { %v237_v23 = vmax.f32 %v236_v22, 0.0 }
 0x16c   : > { %v238_v24 = vadd.f32 1e-05, %v237_v23 }
 0x16e   : > { %478 = vrsqrt.f32 %v238_v24 }
 0x178   : > { %v479_v27 = vpop.eup %478 }
 0x179   : > { %v241_v28 = vmul.f32 %v479_v27, %v240_v26 }
 0x17b   : > { %v242_v29 = vmul.f32 %v241_v28, %v216_v12 }
 0x17d   : > { %244 = vrot.lane.b32.xlu1 %v242_v29, %s598_s8 }
 0x181   : > { %250 = vperm.xlu1 %475, %v241_v28  }
 0x1ef   : > { %v245_v30 = vpop.permute.xlu1 %244 }
 0x1f0   : > { %v247_v31 = vsub.f32 %v240_v26, %v245_v30 }
 0x1f2   : > { %263 = vperm.xlu0 %476, %v247_v31  }
 0x200   : > { %v251_v32 = vpop.permute.xlu1 %250 }
 0x201   : > { %v258_v33 = vrot.slane %v251_v32, %v223_v10 }
 0x203   : > { %v260_v35 = vmul.f32 %v258_v33, %v206_v0 }
 0x271   : > { %v264_v34 = vpop.permute.xlu0 %263 }
 0x272   : > { %v271_v36 = vrot.slane %v264_v34, %v223_v10 }
 0x274   : > { %v273_v37 = vadd.f32 %v271_v36, %v260_v35 }
 0x276   : > { %274 = vst [vmem:[%s198_s16] sm:$0xff] %v273_v37 }
 0x277   : > { %523 = shalt.err (!%p520_p4)
}
 0x278   : > { %s524_s28 = scalar_lea.hbm %s751_s25, 128  ;;  %s528_s30 = scalar_lea.hbm %s802_s2, 256 }
 0x279   : > { %p525_p10 = scmp.ne.s32.totalorder %s751_s25, %s524_s28  ;;  %p529_p2 = scmp.lt.u32.totalorder %s751_s25, %s802_s2 }
 0x27a   : > { %p530_p5 = scmp.lt.u32.totalorder %s528_s30, %s524_s28  ;;  %p532_p9 = scmp.lt.u32.totalorder %s524_s28, %s751_s25 }
 0x27b   : > { %p526_p12 = pnand %p525_p10, %p811_p11 }
 0x27c   : > { %p531_p8 = por %p530_p5, %p529_p2 }
 0x27d   : > { %p527_p1 = pneg %p526_p12 }
 0x27e   : > { %p533_p0 = por %p532_p9, %p531_p8 }
 0x280   : > { %p534_p7 = pnand %p533_p0, %p527_p1 }
 0x282   : > { %537 = shalt.err (!%p534_p7)
}
 0x283   : > { %411 = dma.vmem_to_hbm [thread:$0]  (%p811_p11), %s753_s18, 128, %s751_s25, %s276_s26  }
 0x284 PF: > { %s304_s7 = sand.u32 1, %s572_s9   ;;  %p812_p13 = scmp.ne.s32.totalorder %s807_s24, 0 }
 0x285   : > { %p813_p3 = scmp.ge.s32.totalorder %s592_s14, 2  ;;  %s305_s8 = scalar_lea.sflag [#allocation4], %s304_s7 }
 0x287   : > { %p418_p6 = pnand %p813_p3, %p812_p13 }
 0x289   : > { %567 = dma.done.wait (!%p418_p6), %s305_s8, 128  }
 0x28a   : > { %569 = vsyncadd (!%p418_p6), %s305_s8, 4294967168  ;;  %s18_s14 = sadd.s32 1, %s592_s14   ;;  %s814_s9 = smov %s576_s10 }
 0x28b   : > { %p15_p4 = scmp.ge.s32.totalorder %s18_s14, 4   ;;  %s815_s10 = smov %s580_s11 }
 0x28c   : > { %s816_s11 = smov %s671_s23  ;;  %s817_s12 = smov %s588_s13 }
 0x28d   : > { %s818_s13 = smov %s820_s17  ;;  %17 = sbr.rel (!%p15_p4) target bundleno = 6 (0x6), region = 76 }
 0x294   :  { %310 = vsyncpa [#allocation3], 1 }
 0x295   :  { %312 = vsyncpa [#allocation3 + $0x1], 1 }
 0x296   :  { %313 = vsyncpa [#allocation4], 1 }
 0x297   :  { %315 = vsyncpa [#allocation4 + $0x1], 1 }

</bundles_post_ra>
